<compile_context>
chip_gen: v7x
topology: tpu7x:2x2x1
jax: 0.10.0
libtpu: 0.0.40
codegen_flags: <defaults>
</compile_context>

<pallas_src>
import jax
import jax.numpy as jnp
from jax import lax
from jax.experimental import pallas as pl
from jax.experimental.pallas import tpu as pltpu


def _make_kernel(c, s_rows, a_rows, n_inner, hw, any_mask):
    """Builds the kernel for static (C, S, A, n_inner, HW, any_mask)."""

    def fold_rows(v):
        # (S,128) -> (A,128) via sublane-tile-aligned slice adds (pure VPU).
        if a_rows == s_rows:
            return v
        f = v[0:a_rows]
        for k in range(1, s_rows // a_rows):
            f = f + v[k * a_rows:(k + 1) * a_rows]
        return f

    def kernel(x_ref, t_ref, o_ref):
        # x_ref, t_ref: (1, C, S, 128) blocks; o_ref: (1, 1, A, 128) partial-sum
        # accumulator, resident across the trailing ("arbitrary") ji axis.
        jo = pl.program_id(1)
        ji = pl.program_id(2)

        @pl.when(ji == 0)
        def _():
            o_ref[...] = jnp.zeros_like(o_ref)

        x = x_ref[0].astype(jnp.float32)   # (C, S, 128) full-vreg slabs
        t = t_ref[0].astype(jnp.float32)

        # Channel reductions over axis 0: element-wise ops between (S,128) vregs.
        m = jnp.max(x, axis=0)                       # (S,128)
        xt = jnp.sum(x * t, axis=0)                  # (S,128)
        ts = jnp.sum(t, axis=0)                      # (S,128)
        e = jnp.exp(x - m[None])                     # (C,S,128)  EUP
        s = jnp.sum(e, axis=0)                       # (S,128), >= 1
        log_s = jnp.log(s)                           # (S,128)    EUP

        # z_c = log_softmax(x)_c = x_c - m - log_s <= 0, so BCE-with-logits is
        #   max(z,0) - z*t + log1p(exp(-|z|)) = -z_c*t_c + log(s + e_c) - log_s
        # (no division; one log per channel).  Summed over channels:
        #   pix = -sum_c x_c t_c + (m + log_s) sum_c t_c
        #         + sum_c log(s + e_c) - C * log_s
        lse = jnp.sum(jnp.log(s[None] + e), axis=0)  # (S,128)
        pix = (m + log_s) * ts - xt + lse - float(c) * log_s

        if not any_mask:
            o_ref[...] += fold_rows(pix)[None, None]
        else:
            row0 = (jo * n_inner + ji) * s_rows
            block_is_tail = (row0 + s_rows) * 128 > hw

            @pl.when(jnp.logical_not(block_is_tail))
            def _():
                o_ref[...] += fold_rows(pix)[None, None]

            @pl.when(block_is_tail)
            def _():
                # Zero out padded / out-of-bounds lanes (NaN-safe true select).
                r = lax.broadcasted_iota(jnp.int32, (s_rows, 128), 0)
                l = lax.broadcasted_iota(jnp.int32, (s_rows, 128), 1)
                valid = (row0 + r) * 128 + l < hw
                o_ref[...] += fold_rows(jnp.where(valid, pix, 0.0))[None, None]

    return kernel


def bce_with_logits_loss(inputs, targets, *, block_rows=256, n_split=2,
                         target_dtype=jnp.bfloat16,
                         vmem_limit_bytes=48 * 1024 * 1024):
    """inputs, targets: NCHW arrays of identical shape.

    Returns the scalar f32 mean BCE-with-logits of log_softmax(inputs, dim=1)
    against targets ('mean' reduction over N*C*H*W elements).
    """
    assert inputs.shape == targets.shape
    assert block_rows >= 8 and block_rows % 8 == 0
    n, c, h, w = inputs.shape
    hw = h * w

    # Narrow the streamed target bytes (0/1 segmentation targets are exact in
    # bf16); all in-kernel math is f32.
    targets = targets.astype(target_dtype)

    # Free, contiguous reshape (no transpose): flatten spatial, then split it
    # into (rows, 128) so every per-channel slab fills whole (8,128) vregs.
    hw_pad = ((hw + 127) // 128) * 128
    x3 = inputs.reshape(n, c, hw)
    t3 = targets.reshape(n, c, hw)
    if hw_pad != hw:
        # Only hit when H*W is not a multiple of 128 (never for typical
        # segmentation shapes like 512x512); padded lanes are masked in-kernel.
        pad = ((0, 0), (0, 0), (0, hw_pad - hw))
        x3 = jnp.pad(x3, pad)
        t3 = jnp.pad(t3, pad)
    r_rows = hw_pad // 128
    x4 = x3.reshape(n, c, r_rows, 128)
    t4 = t3.reshape(n, c, r_rows, 128)

    # Spatial block: S rows x 128 lanes (default 32768 elements per block).
    if r_rows <= block_rows:
        s_rows = r_rows                   # full extent (always a legal block)
    else:
        s_rows = block_rows               # multiple of 8
    a_rows = 8 if (s_rows >= 8 and s_rows % 8 == 0) else s_rows

    n_tiles = pl.cdiv(r_rows, s_rows)
    # Outer "parallel" spatial split keeps both v7x TensorCores busy at N=1;
    # no-op on single-TC v5e/v6e.
    n_outer = n_split if n_tiles >= n_split else 1
    n_inner = pl.cdiv(n_tiles, n_outer)

    # Masking code is only compiled in if some block can touch invalid lanes.
    any_mask = (n_outer * n_inner * s_rows * 128) != hw
    kernel = _make_kernel(c, s_rows, a_rows, n_inner, hw, any_mask)

    partials = pl.pallas_call(
        kernel,
        out_shape=jax.ShapeDtypeStruct((n, n_outer, a_rows, 128), jnp.float32),
        grid=(n, n_outer, n_inner),
        in_specs=[
            pl.BlockSpec((1, c, s_rows, 128),
                         lambda i, jo, ji: (i, 0, jo * n_inner + ji, 0)),
            pl.BlockSpec((1, c, s_rows, 128),
                         lambda i, jo, ji: (i, 0, jo * n_inner + ji, 0)),
        ],
        out_specs=pl.BlockSpec((1, 1, a_rows, 128),
                               lambda i, jo, ji: (i, jo, 0, 0)),
        compiler_params=pltpu.CompilerParams(
            dimension_semantics=("parallel", "parallel", "arbitrary"),
            vmem_limit_bytes=vmem_limit_bytes,
        ),
    )(x4, t4)

    inv_count = 1.0 / float(n * c * h * w)           # true element count
    return jnp.sum(partials) * jnp.float32(inv_count)


def _reference(inputs, targets):
    # Pure-JAX reference (standard stable BCE-with-logits on log_softmax).
    z = jax.nn.log_softmax(inputs.astype(jnp.float32), axis=1)
    t = targets.astype(jnp.float32)
    per = jnp.maximum(z, 0.0) - z * t + jnp.log1p(jnp.exp(-jnp.abs(z)))
    return jnp.mean(per)


def _check(inputs, targets, **kw):
    loss = bce_with_logits_loss(inputs, targets, **kw)
    jax.block_until_ready(loss)
    ref = _reference(inputs, targets)
    assert jnp.allclose(loss, ref, atol=1e-5, rtol=1e-5), (loss, ref)


if __name__ == "__main__":
    key = jax.random.PRNGKey(0)
    ks = jax.random.split(key, 8)

    # 1) Small segmentation-head-like shape: N=2, C=4, H=W=16 (NCHW).
    x1 = jax.random.normal(ks[0], (2, 4, 16, 16), dtype=jnp.float32)
    t1 = (jax.random.uniform(ks[1], (2, 4, 16, 16)) > 0.5).astype(jnp.float32)
    _check(x1, t1)

    # 2) H*W not a multiple of 128: exercises wrapper padding + tail masking.
    x2 = jax.random.normal(ks[2], (1, 3, 10, 30), dtype=jnp.float32)
    t2 = (jax.random.uniform(ks[3], (1, 3, 10, 30)) > 0.5).astype(jnp.float32)
    _check(x2, t2)

    # 3) Multiple outer (parallel) and inner (reduction) spatial tiles.
    x3 = jax.random.normal(ks[4], (2, 5, 32, 128), dtype=jnp.float32)
    t3 = (jax.random.uniform(ks[5], (2, 5, 32, 128)) > 0.5).astype(jnp.float32)
    _check(x3, t3, block_rows=8)

    # 4) Padded + multi-tile + partially-valid tail block.
    x4 = jax.random.normal(ks[6], (1, 3, 48, 28), dtype=jnp.float32)
    t4 = (jax.random.uniform(ks[7], (1, 3, 48, 28)) > 0.5).astype(jnp.float32)
    _check(x4, t4, block_rows=8)

    print("KERNEL_OK")
</pallas_src>

<mosaic_0001>
module attributes {stable_mosaic.version = 11 : i64} {
  func.func @kernel(%arg0: i32, %arg1: i32, %arg2: i32, %arg3: memref<1x4x2x128xf32, #tpu.memory_space<vmem>>, %arg4: memref<1x4x2x128xbf16, #tpu.memory_space<vmem>>, %arg5: memref<1x1x2x128xf32, #tpu.memory_space<vmem>>) attributes {dimension_semantics = [#tpu.dimension_semantics<parallel>, #tpu.dimension_semantics<parallel>, #tpu.dimension_semantics<arbitrary>], iteration_bounds = array<i64: 2, 1, 1>, scalar_prefetch = 0 : i64, scratch_operands = 0 : i64, tpu.core_type = #tpu.core_type<tc>, window_params = [{transform_indices = @transform_0, window_bounds = array<i64: 1, 4, 2, 128>}, {transform_indices = @transform_1, window_bounds = array<i64: 1, 4, 2, 128>}, {transform_indices = @transform_2, window_bounds = array<i64: 1, 1, 2, 128>}]} {
    %c0_i32 = arith.constant 0 : i32
    %0 = arith.cmpi eq, %arg2, %c0_i32 : i32
    %1 = arith.extui %0 : i1 to i32
    %c0_i32_0 = arith.constant 0 : i32
    %2 = arith.cmpi ne, %1, %c0_i32_0 : i32
    scf.if %2 {
      %cst_21 = arith.constant 0.000000e+00 : f32
      %34 = vector.broadcast %cst_21 : f32 to vector<1x1x2x128xf32>
      %c0_22 = arith.constant 0 : index
      %c0_23 = arith.constant 0 : index
      %c0_24 = arith.constant 0 : index
      %c0_25 = arith.constant 0 : index
      %35 = vector.load %arg5[%c0_22, %c0_23, %c0_24, %c0_25] : memref<1x1x2x128xf32, #tpu.memory_space<vmem>>, vector<1x1x2x128xf32>
      tpu.vector_store %arg5[%c0_22, %c0_23, %c0_24, %c0_25], %34 {strides = array<i32>} : memref<1x1x2x128xf32, #tpu.memory_space<vmem>>, vector<1x1x2x128xf32>,
    } else {
    }
    %c0 = arith.constant 0 : index
    %c0_1 = arith.constant 0 : index
    %c0_2 = arith.constant 0 : index
    %c0_3 = arith.constant 0 : index
    %3 = vector.load %arg3[%c0, %c0_1, %c0_2, %c0_3] : memref<1x4x2x128xf32, #tpu.memory_space<vmem>>, vector<1x4x2x128xf32>
    %4 = vector.shape_cast %3 : vector<1x4x2x128xf32> to vector<4x2x128xf32>
    %c0_4 = arith.constant 0 : index
    %c0_5 = arith.constant 0 : index
    %c0_6 = arith.constant 0 : index
    %c0_7 = arith.constant 0 : index
    %5 = vector.load %arg4[%c0_4, %c0_5, %c0_6, %c0_7] : memref<1x4x2x128xbf16, #tpu.memory_space<vmem>>, vector<1x4x2x128xbf16>
    %6 = vector.shape_cast %5 : vector<1x4x2x128xbf16> to vector<4x2x128xbf16>
    %7 = arith.extf %6 : vector<4x2x128xbf16> to vector<4x2x128xf32>
    %cst = arith.constant dense<0xFF800000> : vector<2x128xf32>
    %8 = vector.multi_reduction <maximumf>, %4, %cst [0] : vector<4x2x128xf32> to vector<2x128xf32>
    %9 = arith.mulf %4, %7 : vector<4x2x128xf32>
    %cst_8 = arith.constant dense<0.000000e+00> : vector<2x128xf32>
    %10 = vector.multi_reduction <add>, %9, %cst_8 [0] : vector<4x2x128xf32> to vector<2x128xf32>
    %cst_9 = arith.constant dense<0.000000e+00> : vector<2x128xf32>
    %11 = vector.multi_reduction <add>, %7, %cst_9 [0] : vector<4x2x128xf32> to vector<2x128xf32>
    %12 = vector.shape_cast %8 : vector<2x128xf32> to vector<1x2x128xf32>
    %13 = vector.broadcast %12 : vector<1x2x128xf32> to vector<4x2x128xf32>
    %14 = arith.subf %4, %13 : vector<4x2x128xf32>
    %15 = math.exp %14 : vector<4x2x128xf32>
    %cst_10 = arith.constant dense<0.000000e+00> : vector<2x128xf32>
    %16 = vector.multi_reduction <add>, %15, %cst_10 [0] : vector<4x2x128xf32> to vector<2x128xf32>
    %17 = math.log %16 : vector<2x128xf32>
    %18 = vector.shape_cast %16 : vector<2x128xf32> to vector<1x2x128xf32>
    %19 = vector.broadcast %18 : vector<1x2x128xf32> to vector<4x2x128xf32>
    %20 = arith.addf %19, %15 : vector<4x2x128xf32>
    %21 = math.log %20 : vector<4x2x128xf32>
    %cst_11 = arith.constant dense<0.000000e+00> : vector<2x128xf32>
    %22 = vector.multi_reduction <add>, %21, %cst_11 [0] : vector<4x2x128xf32> to vector<2x128xf32>
    %23 = arith.addf %8, %17 : vector<2x128xf32>
    %24 = arith.mulf %23, %11 : vector<2x128xf32>
    %25 = arith.subf %24, %10 : vector<2x128xf32>
    %26 = arith.addf %25, %22 : vector<2x128xf32>
    %cst_12 = arith.constant 4.000000e+00 : f32
    %27 = vector.broadcast %cst_12 : f32 to vector<2x128xf32>
    %28 = arith.mulf %27, %17 : vector<2x128xf32>
    %29 = arith.subf %26, %28 : vector<2x128xf32>
    %c0_13 = arith.constant 0 : index
    %c0_14 = arith.constant 0 : index
    %c0_15 = arith.constant 0 : index
    %c0_16 = arith.constant 0 : index
    %30 = vector.load %arg5[%c0_13, %c0_14, %c0_15, %c0_16] : memref<1x1x2x128xf32, #tpu.memory_space<vmem>>, vector<1x1x2x128xf32>
    %31 = vector.shape_cast %29 : vector<2x128xf32> to vector<1x1x2x128xf32>
    %32 = arith.addf %30, %31 : vector<1x1x2x128xf32>
    %c0_17 = arith.constant 0 : index
    %c0_18 = arith.constant 0 : index
    %c0_19 = arith.constant 0 : index
    %c0_20 = arith.constant 0 : index
    %33 = vector.load %arg5[%c0_17, %c0_18, %c0_19, %c0_20] : memref<1x1x2x128xf32, #tpu.memory_space<vmem>>, vector<1x1x2x128xf32>
    tpu.vector_store %arg5[%c0_17, %c0_18, %c0_19, %c0_20], %32 {strides = array<i32>} : memref<1x1x2x128xf32, #tpu.memory_space<vmem>>, vector<1x1x2x128xf32>,
    return
  }
  func.func @transform_0(%arg0: i32, %arg1: i32, %arg2: i32) -> (i32, i32, i32, i32) {
    %c1_i32 = arith.constant 1 : i32
    %0 = arith.muli %arg1, %c1_i32 : i32
    %1 = arith.addi %0, %arg2 : i32
    %c0_i32 = arith.constant 0 : i32
    %c0_i32_0 = arith.constant 0 : i32
    %c0_i32_1 = arith.constant 0 : i32
    return %arg0, %c0_i32, %1, %c0_i32_0 : i32, i32, i32, i32
  }
  func.func @transform_1(%arg0: i32, %arg1: i32, %arg2: i32) -> (i32, i32, i32, i32) {
    %c1_i32 = arith.constant 1 : i32
    %0 = arith.muli %arg1, %c1_i32 : i32
    %1 = arith.addi %0, %arg2 : i32
    %c0_i32 = arith.constant 0 : i32
    %c0_i32_0 = arith.constant 0 : i32
    %c0_i32_1 = arith.constant 0 : i32
    return %arg0, %c0_i32, %1, %c0_i32_0 : i32, i32, i32, i32
  }
  func.func @transform_2(%arg0: i32, %arg1: i32, %arg2: i32) -> (i32, i32, i32, i32) {
    %c0_i32 = arith.constant 0 : i32
    %c0_i32_0 = arith.constant 0 : i32
    %c0_i32_1 = arith.constant 0 : i32
    return %arg0, %arg1, %c0_i32, %c0_i32_0 : i32, i32, i32, i32
  }
}

</mosaic_0001>

<bundles_post_ra>
// kernel: tpu_custom_call.1
= control target key start
LH: loop header
LB: loop body
LE: loop exit
PB: predicated region body
PF: predicated region fallthrough
CT: control target
= control target key end

     0   :  { %7 = vsyncpa [#allocation3], 0  ;;  %s999_s0 = inlined_call_operand.hbm [shape: f32[2,4,2,128], index: 0, kind: input, shape index: {}]   ;;  %s1000_s1 = inlined_call_operand.hbm [shape: bf16[2,4,2,128], index: 1, kind: input, shape index: {}]   ;;  %s1001_s2 = inlined_call_operand.hbm [shape: f32[2,1,2,128], index: 2, kind: output, shape index: {}]  }
   0x1   :  { %9 = vsyncpa [#allocation3 + $0x1], 0 }
   0x2   :  { %10 = vsyncpa [#allocation6], 0 }
   0x3   :  { %12 = vsyncpa [#allocation6 + $0x1], 0 }
   0x4   :  { %13 = vsyncpa [#allocation4], 0 }
   0x5   :  { %15 = vsyncpa [#allocation4 + $0x1], 0  ;;  %s736_s9 = smov 0   ;;  %s738_s10 = smov 0  }
   0x6   :  { %s740_s11 = smov 0   ;;  %s742_s12 = smov 0  }
   0x7   :  { %s744_s13 = smov 0   ;;  %s746_s14 = smov 0  }
   0x8 LB: > { %s455_s15 = sadd.s32 4294967295, %s711_s14   ;;  %s456_s16 = sadd.s32 4294967294, %s711_s14   ;;  %s711_s14 = sphi %s746_s14, %s21_s14   ;;  %s707_s13 = sphi %s744_s13, %s1019_s13   ;;  %s703_s12 = sphi %s742_s12, %s1018_s12   ;;  %s699_s11 = sphi %s740_s11, %s1017_s11   ;;  %s695_s10 = sphi %s738_s10, %s1016_s10   ;;  %s691_s9 = sphi %s736_s9, %s1015_s9  }
   0x9   : > { %s40_s17 = sadd.s32 1, %s707_s13  ;;  %s51_s18 = sadd.s32 1, %s699_s11 }
   0xa   : > { %p42_p0 = scmp.ge.s32.totalorder %s40_s17, 2  ;;  %p58_p1 = scmp.ne.s32.totalorder %s699_s11, %s695_s10 }
   0xb   : > { %p59_p2 = scmp.eq.s32.totalorder %s711_s14, 0  ;;  %p64_p3 = scmp.ne.s32.totalorder %s695_s10, %s691_s9 }
   0xc   : > { %s1021_s17 = smov (%p42_p0, %s40_s17), 0  ;;  %p65_p5 = scmp.eq.s32.totalorder %s455_s15, 0 }
   0xd   : > { %p777_p4 = por %p59_p2, %p58_p1  ;;  %s46_s20 = ssub.s32 %s707_s13, %s1021_s17 }
   0xe   : > { %p120_p6 = scmp.eq.s32.totalorder %s455_s15, 1  ;;  %p49_p7 = scmp.eq.s32.totalorder %s46_s20, 0 }
   0xf   : > { %p783_p8 = por %p65_p5, %p64_p3  ;;  %p126_p10 = scmp.eq.s32.totalorder %s456_s16, 1 }
  0x10   : > { %p787_p9 = por %p120_p6, %p58_p1  ;;  %p492_p13 = scmp.lt.s32.totalorder %s711_s14, 2 }
  0x11   : > { %s1005_s21 = scalar_select %p783_p8, 1, 0 }
  0x12   : > { %s1006_s22 = scalar_select %p787_p9, 1, 0 }
  0x13   : > { %s792_s23 = scalar_select %p49_p7, %s699_s11, %s51_s18  }
  0x14   : > { %p794_p11 = por %p126_p10, %p64_p3  ;;  %s801_s25 = sand.u32 1, %s699_s11  }
  0x15   : > { %s459_s26 = sshll.u32 %s801_s25, 3  ;;  %s473_s27 = sshll.u32 %s707_s13, 7 }
  0x16   : > { %s1007_s24 = scalar_select %p794_p11, 1, 0 }
  0x17   : > { %s808_s30 = scalar_lea.hbm %s999_s0, %s473_s27  ;;  %s150_s3 = scalar_lea.vmem [#allocation2], %s459_s26 }
  0x18   : > { %s159_s4 = sshll.u32 %s150_s3, 4  ;;  %p814_p0 = pnand %p492_p13, %p777_p4  ;;  %s810_s4 = int_to_ptr.vmem [resolvable:$true] %s159_s4 }
  0x19   : > { %s147_s6 = scalar_lea.sflag [#allocation3], %s801_s25  ;;  %s565_s7 = scalar_lea.hbm %s808_s30, 128 }
  0x1a   : > { %p566_p2 = scmp.ne.s32.totalorder %s808_s30, %s565_s7  ;;  %p567_p3 = pneg %p814_p0 }
  0x1b   : > { %s570_s16 = scalar_lea.hbm %s999_s0, 256  ;;  %p571_p4 = scmp.lt.u32.totalorder %s808_s30, %s999_s0 }
  0x1c   : > { %p568_p5 = pnand %p567_p3, %p566_p2  ;;  %p572_p7 = scmp.lt.u32.totalorder %s570_s16, %s565_s7 }
  0x1d   : > { %p574_p13 = scmp.lt.u32.totalorder %s565_s7, %s808_s30 }
  0x1e   : > { %p569_p6 = pneg %p568_p5  ;;  %p573_p10 = por %p572_p7, %p571_p4 }
  0x20   : > { %p575_p12 = por %p574_p13, %p573_p10 }
  0x22   : > { %p576_p1 = pnand %p575_p12, %p569_p6 }
  0x24   : > { %579 = shalt.err (!%p576_p1)
}
  0x25   : > { %s580_s20 = scalar_lea.vmem %s810_s4, 128  ;;  %s713_s26 = smov [#allocation2]  }
  0x26   : > { %p581_p2 = scmp.ne.s32.totalorder %s810_s4, %s580_s20  ;;  %s585_s27 = sshll.u32 %s713_s26, 4  ;;  %s586_s27 = int_to_ptr.vmem [resolvable:$false] %s585_s27 }
  0x27   : > { %s587_s28 = scalar_lea.vmem %s586_s27, 256  ;;  %p588_p9 = scmp.lt.s32.totalorder %s810_s4, %s586_s27 }
  0x28   : > { %p583_p5 = pnand %p581_p2, %p567_p3  ;;  %p589_p4 = scmp.lt.s32.totalorder %s587_s28, %s580_s20 }
  0x2a   : > { %p584_p11 = pneg %p583_p5  ;;  %p590_p7 = por %p589_p4, %p588_p9 }
  0x2c   : > { %p591_p10 = pnand %p590_p7, %p584_p11 }
  0x2e   : > { %594 = shalt.err (!%p591_p10)
}
  0x2f   : > { %s714_s29 = smov 32   ;;  %s715_s3 = smov 2  }
  0x30   : > { %484 = dma.hbm_to_vmem [thread:$0]  (!%p814_p0), %s808_s30, 128, %s810_s4, %s147_s6, %s714_s29, %s714_s29, %s715_s3  }
  0x31   : > { %p190_p12 = scmp.lt.s32.totalorder %s711_s14, 3  ;;  %s462_s7 = sshll.u32 %s801_s25, 2 }
  0x32   : > { %s474_s8 = sshll.u32 %s707_s13, 6  ;;  %p1009_p9 = scmp.ge.s32.totalorder %s711_s14, 1 }
  0x33   : > { %s859_s19 = scalar_lea.hbm %s1000_s1, %s474_s8  ;;  %s173_s20 = scalar_lea.vmem [#allocation5], %s462_s7 }
  0x34   : > { %p852_p11 = pnand %p1009_p9, %p190_p12  ;;  %s182_s26 = sshll.u32 %s173_s20, 4  ;;  %s861_s26 = int_to_ptr.vmem [resolvable:$true] %s182_s26 }
  0x35   : > { %s170_s30 = scalar_lea.sflag [#allocation6], %s801_s25  ;;  %s595_s4 = scalar_lea.hbm %s859_s19, 64 }
  0x36   : > { %p596_p1 = scmp.ne.s32.totalorder %s859_s19, %s595_s4  ;;  %s600_s28 = scalar_lea.hbm %s1000_s1, 128 }
  0x37   : > { %p601_p2 = scmp.lt.u32.totalorder %s859_s19, %s1000_s1  ;;  %p602_p5 = scmp.lt.u32.totalorder %s600_s28, %s595_s4 }
  0x38   : > { %p598_p6 = pnand %p596_p1, %p567_p3  ;;  %p604_p7 = scmp.lt.u32.totalorder %s595_s4, %s859_s19 }
  0x39   : > { %p603_p4 = por %p602_p5, %p601_p2 }
  0x3a   : > { %p599_p13 = pneg %p598_p6 }
  0x3b   : > { %p605_p10 = por %p604_p7, %p603_p4 }
  0x3d   : > { %p606_p12 = pnand %p605_p10, %p599_p13 }
  0x3f   : > { %609 = shalt.err (!%p606_p12)
}
  0x40   : > { %s610_s7 = scalar_lea.vmem %s861_s26, 64  ;;  %s716_s8 = smov [#allocation5]  }
  0x41   : > { %p611_p9 = scmp.ne.s32.totalorder %s861_s26, %s610_s7  ;;  %s615_s16 = sshll.u32 %s716_s8, 4  ;;  %s616_s16 = int_to_ptr.vmem [resolvable:$false] %s615_s16 }
  0x42   : > { %s617_s18 = scalar_lea.vmem %s616_s16, 128  ;;  %p618_p8 = scmp.lt.s32.totalorder %s861_s26, %s616_s16 }
  0x43   : > { %p613_p1 = pnand %p611_p9, %p567_p3  ;;  %p619_p2 = scmp.lt.s32.totalorder %s617_s18, %s610_s7 }
  0x45   : > { %p614_p6 = pneg %p613_p1  ;;  %p620_p5 = por %p619_p2, %p618_p8 }
  0x47   : > { %p621_p4 = pnand %p620_p5, %p614_p6 }
  0x49   : > { %624 = shalt.err (!%p621_p4)
}
  0x4a   : > { %s717_s20 = smov 16   ;;  %s718_s4 = smov 1  }
  0x4b   : > { %487 = dma.hbm_to_vmem [thread:$0]  (!%p814_p0), %s859_s19, 64, %s861_s26, %s170_s30, %s717_s20, %s717_s20, %s718_s4  }
  0x4c   : > { %194 = sbr.rel (%p852_p11) target bundleno = 161 (0xa1), region = 28  ;;  %s892_s6 = sand.u32 (!%p852_p11), 1, %s695_s10  }
  0x4d   : > { %s466_s27 = sshll.u32 (!%p852_p11), %s892_s6, 3  ;;  %s197_s28 = scalar_lea.sflag (!%p852_p11), [#allocation3], %s892_s6 }
  0x4e   : > { %s200_s29 = scalar_lea.vmem (!%p852_p11), [#allocation2], %s466_s27  ;;  %p1011_p8 = scmp.ne.s32.totalorder (!%p852_p11), %s1005_s21, 0 }
  0x53   : > { %678 = dma.done.wait (%p1011_p8), %s197_s28, 128  }
  0x54   : > { %680 = vsyncadd (%p1011_p8), %s197_s28, 4294967168  ;;  %s467_s25 = sshll.u32 %s892_s6, 2  ;;  %s206_s5 = scalar_lea.sflag [#allocation6], %s892_s6 }
  0x55   : > { %s902_s15 = scalar_lea.vmem [#allocation5], %s467_s25 }
  0x56   : > { %682 = dma.done.wait (%p1011_p8), %s206_s5, 64  }
  0x57   : > { %684 = vsyncadd (%p1011_p8), %s206_s5, 4294967232  ;;  %s468_s19 = sshll.u32 %s892_s6, 1  ;;  %v719_v0 = vmov 0.0   ;;  %vm254_vm0 = vcmask 1041408   ;;  %v242_v1 = vld [vmem:[%s200_s29] sm:$0x3] }
  0x58   : > { %s909_s26 = scalar_lea.vmem [#allocation7], %s468_s19  ;;  %v243_v2 = vld [vmem:[%s200_s29 + $0x2] sm:$0x3]  ;;  %v244_v3 = vld [vmem:[%s200_s29 + $0x4] sm:$0x3]  ;;  %v255_v5 = vsel %vm254_vm0, %v242_v1, -inf }
  0x59   : > { %241 = vst [vmem:[%s909_s26] sm:$0x3] %v719_v0  ;;  %v245_v4 = vld [vmem:[%s200_s29 + $0x6] sm:$0x3]  ;;  %v256_v6 = vsel %vm254_vm0, %v243_v2, -inf  ;;  %v257_v7 = vsel %vm254_vm0, %v244_v3, -inf  ;;  %s470_s21 = sshll.u32 %s703_s12, 5 }
  0x5a   : > { %v258_v8 = vsel %vm254_vm0, %v245_v4, -inf  ;;  %v259_v9 = vmax.f32 %v255_v5, %v256_v6  ;;  %v246_v22 = vld [vmem:[%s902_s15] sm:$0x1]  ;;  %v247_v23 = vld [vmem:[%s902_s15 + $0x1] sm:$0x1]  ;;  %s344_s30 = sshll.u32 %s909_s26, 4  ;;  %s949_s8 = scalar_lea.hbm %s1001_s2, %s470_s21  ;;  %s951_s30 = int_to_ptr.vmem [resolvable:$true] %s344_s30 }
  0x5b   : > { %v260_v10 = vmax.f32 %v257_v7, %v258_v8  ;;  %v248_v30 = vld [vmem:[%s902_s15 + $0x2] sm:$0x1]  ;;  %v250_v31 = vunpack.c.l.bf16 %v246_v22  ;;  %v251_v32 = vunpack.c.l.bf16 %v247_v23  ;;  %v249_v41 = vld [vmem:[%s902_s15 + $0x3] sm:$0x1]  ;;  %s330_s16 = scalar_lea.sflag [#allocation4], %s892_s6  ;;  %s625_s18 = scalar_lea.vmem %s951_s30, 32 }
  0x5c   : > { %v252_v35 = vunpack.c.l.bf16 %v248_v30  ;;  %v253_v46 = vunpack.c.l.bf16 %v249_v41  ;;  %p626_p0 = scmp.ne.s32.totalorder %s951_s30, %s625_s18  ;;  %p1012_p3 = scmp.ne.s32.totalorder %s1006_s22, 0 }
  0x5d   : > { %v916_v11 = vmax.f32 %v259_v9, %v260_v10  ;;  %v262_v37 = vmul.f32 %v250_v31, %v242_v1  ;;  %v263_v38 = vmul.f32 %v251_v32, %v243_v2  ;;  %v273_v39 = vsel %vm254_vm0, %v250_v31, 0.0  ;;  %s720_s12 = smov [#allocation7]  }
  0x5e   : > { %v274_v40 = vsel %vm254_vm0, %v251_v32, 0.0  ;;  %v264_v47 = vmul.f32 %v252_v35, %v244_v3  ;;  %v276_v51 = vsel %vm254_vm0, %v252_v35, 0.0  ;;  %v265_v54 = vmul.f32 %v253_v46, %v245_v4  ;;  %p627_p11 = pnand %p626_p0, %p1012_p3  ;;  %s629_s20 = sshll.u32 %s720_s12, 4  ;;  %s630_s20 = int_to_ptr.vmem [resolvable:$false] %s629_s20 }
  0x5f   : > { %v280_v12 = vsub.f32 %v242_v1, %v916_v11  ;;  %v281_v13 = vsub.f32 %v243_v2, %v916_v11  ;;  %v282_v14 = vsub.f32 %v244_v3, %v916_v11  ;;  %v283_v15 = vsub.f32 %v245_v4, %v916_v11  ;;  %s631_s4 = scalar_lea.vmem %s630_s20, 64  ;;  %p632_p7 = scmp.lt.s32.totalorder %s951_s30, %s630_s20 }
  0x60   : > { %v275_v48 = vadd.f32 %v274_v40, %v273_v39  ;;  %v266_v49 = vsel %vm254_vm0, %v262_v37, 0.0  ;;  %v267_v50 = vsel %vm254_vm0, %v263_v38, 0.0  ;;  %v269_v55 = vsel %vm254_vm0, %v264_v47, 0.0  ;;  %p628_p13 = pneg %p627_p11  ;;  %p633_p10 = scmp.lt.s32.totalorder %s631_s4, %s625_s18 }
  0x61   : > { %v284_v16 = vmul.f32 1.442695, %v280_v12  ;;  %v286_v17 = vmul.f32 1.442695, %v281_v13  ;;  %v288_v18 = vmul.f32 1.442695, %v282_v14  ;;  %v268_v52 = vadd.f32 %v267_v50, %v266_v49 }
  0x62   : > { %v290_v19 = vmul.f32 1.442695, %v283_v15  ;;  %v277_v53 = vadd.f32 %v276_v51, %v275_v48  ;;  %v278_v56 = vsel %vm254_vm0, %v253_v46, 0.0  ;;  %v271_v62 = vsel %vm254_vm0, %v265_v54, 0.0  ;;  %p634_p12 = por %p633_p10, %p632_p7 }
  0x63   : > { %547 = vpow2.f32 %v284_v16  ;;  %v270_v58 = vadd.f32 %v269_v55, %v268_v52 }
  0x64   : > { %549 = vpow2.f32 %v286_v17  ;;  %v279_v59 = vadd.f32 %v278_v56, %v277_v53  ;;  %p635_p9 = pnand %p634_p12, %p628_p13 }
  0x65   : > { %551 = vpow2.f32 %v288_v18  ;;  %v272_v4 = vadd.f32 %v271_v62, %v270_v58 }
  0x66   : > { %553 = vpow2.f32 %v290_v19  ;;  %v326_v19 = vld [vmem:[%s909_s26] sm:$0x3] }
  0x6d   : > { %v548_v20 = vpop.eup %547 }
  0x6e   : > { %v550_v21 = vpop.eup %549  ;;  %v292_v24 = vsel %vm254_vm0, %v548_v20, 0.0 }
  0x6f   : > { %v552_v25 = vpop.eup %551  ;;  %v293_v26 = vsel %vm254_vm0, %v550_v21, 0.0 }
  0x70   : > { %v554_v27 = vpop.eup %553  ;;  %v294_v28 = vadd.f32 %v293_v26, %v292_v24  ;;  %v295_v29 = vsel %vm254_vm0, %v552_v25, 0.0 }
  0x71   : > { %v297_v33 = vsel %vm254_vm0, %v554_v27, 0.0 }
  0x72   : > { %v296_v34 = vadd.f32 %v295_v29, %v294_v28 }
  0x74   : > { %v298_v36 = vadd.f32 %v297_v33, %v296_v34 }
  0x76   : > { %555 = vlog2.f32 %v298_v36  ;;  %v301_v42 = vadd.f32 %v548_v20, %v298_v36  ;;  %v302_v43 = vadd.f32 %v550_v21, %v298_v36  ;;  %v303_v44 = vadd.f32 %v552_v25, %v298_v36 }
  0x77   : > { %v304_v45 = vadd.f32 %v554_v27, %v298_v36 }
  0x78   : > { %557 = vlog2.f32 %v301_v42 }
  0x79   : > { %559 = vlog2.f32 %v302_v43 }
  0x7a   : > { %561 = vlog2.f32 %v303_v44 }
  0x7b   : > { %563 = vlog2.f32 %v304_v45 }
  0x80   : > { %v556_v57 = vpop.eup %555 }
  0x81   : > { %v300_v60 = vmul.f32 0.6931472, %v556_v57 }
  0x82   : > { %v558_v61 = vpop.eup %557 }
  0x83   : > { %v560_v63 = vpop.eup %559  ;;  %v306_v0 = vmul.f32 0.6931472, %v558_v61  ;;  %v320_v1 = vadd.f32 %v300_v60, %v916_v11  ;;  %v324_v17 = vmul.f32 4.0, %v300_v60 }
  0x84   : > { %v562_v2 = vpop.eup %561  ;;  %v308_v3 = vmul.f32 0.6931472, %v560_v63 }
  0x85   : > { %v564_v5 = vpop.eup %563  ;;  %v310_v6 = vmul.f32 0.6931472, %v562_v2  ;;  %v313_v7 = vsel %vm254_vm0, %v306_v0, 0.0  ;;  %v321_v8 = vmul.f32 %v320_v1, %v279_v59 }
  0x86   : > { %v312_v9 = vmul.f32 0.6931472, %v564_v5  ;;  %v314_v10 = vsel %vm254_vm0, %v308_v3, 0.0 }
  0x87   : > { %v315_v12 = vadd.f32 %v314_v10, %v313_v7  ;;  %v316_v13 = vsel %vm254_vm0, %v310_v6, 0.0  ;;  %v322_v15 = vsub.f32 %v321_v8, %v272_v4 }
  0x88   : > { %v318_v11 = vsel %vm254_vm0, %v312_v9, 0.0 }
  0x89   : > { %v317_v14 = vadd.f32 %v316_v13, %v315_v12 }
  0x8b   : > { %v319_v16 = vadd.f32 %v318_v11, %v317_v14 }
  0x8d   : > { %v323_v18 = vadd.f32 %v322_v15, %v319_v16 }
  0x8f   : > { %v325_v20 = vsub.f32 %v323_v18, %v324_v17 }
  0x91   : > { %v327_v21 = vadd.f32 %v326_v19, %v325_v20 }
  0x93   : > { %328 = vst [vmem:[%s909_s26] sm:$0x3] %v327_v21 }
  0x94   : > { %638 = shalt.err (!%p635_p9)
}
  0x95   : > { %s639_s6 = scalar_lea.hbm %s949_s8, 32  ;;  %s643_s29 = scalar_lea.hbm %s1001_s2, 64 }
  0x96   : > { %p640_p1 = scmp.ne.s32.totalorder %s949_s8, %s639_s6  ;;  %p644_p5 = scmp.lt.u32.totalorder %s949_s8, %s1001_s2 }
  0x97   : > { %p645_p4 = scmp.lt.u32.totalorder %s643_s29, %s639_s6  ;;  %p647_p0 = scmp.lt.u32.totalorder %s639_s6, %s949_s8 }
  0x98   : > { %p641_p6 = pnand %p640_p1, %p1012_p3 }
  0x99   : > { %p646_p8 = por %p645_p4, %p644_p5 }
  0x9a   : > { %p642_p2 = pneg %p641_p6 }
  0x9b   : > { %p648_p11 = por %p647_p0, %p646_p8 }
  0x9d   : > { %p649_p13 = pnand %p648_p11, %p642_p2 }
  0x9f   : > { %652 = shalt.err (!%p649_p13)
}
  0xa0   : > { %479 = dma.vmem_to_hbm [thread:$0]  (%p1012_p3), %s951_s30, 32, %s949_s8, %s330_s16  }
  0xa1 PF: > { %s356_s15 = sand.u32 1, %s691_s9   ;;  %p1013_p7 = scmp.ne.s32.totalorder %s1007_s24, 0 }
  0xa2   : > { %p1014_p10 = scmp.ge.s32.totalorder %s711_s14, 2  ;;  %s357_s19 = scalar_lea.sflag [#allocation4], %s356_s15 }
  0xa4   : > { %p489_p12 = pnand %p1014_p10, %p1013_p7 }
  0xa6   : > { %686 = dma.done.wait (!%p489_p12), %s357_s19, 32  }
  0xa7   : > { %688 = vsyncadd (!%p489_p12), %s357_s19, 4294967264  ;;  %s21_s14 = sadd.s32 1, %s711_s14   ;;  %s1015_s9 = smov %s695_s10 }
  0xa8   : > { %p18_p9 = scmp.ge.s32.totalorder %s21_s14, 4   ;;  %s1016_s10 = smov %s699_s11 }
  0xa9   : > { %s1017_s11 = smov %s792_s23  ;;  %s1018_s12 = smov %s707_s13 }
  0xaa   : > { %s1019_s13 = smov %s1021_s17  ;;  %20 = sbr.rel (!%p18_p9) target bundleno = 8 (0x8), region = 90 }
  0xb1   :  { %362 = vsyncpa [#allocation3], 1 }
  0xb2   :  { %364 = vsyncpa [#allocation3 + $0x1], 1 }
  0xb3   :  { %365 = vsyncpa [#allocation6], 1 }
  0xb4   :  { %367 = vsyncpa [#allocation6 + $0x1], 1 }
  0xb5   :  { %368 = vsyncpa [#allocation4], 1 }
  0xb6   :  { %370 = vsyncpa [#allocation4 + $0x1], 1 }

</bundles_post_ra>
